<compile_context>
chip_gen: v7x
topology: tpu7x:2x2x1
jax: 0.10.0
libtpu: 0.0.40
codegen_flags: <defaults>
</compile_context>

<pallas_src>
import functools

import jax
import jax.numpy as jnp
from jax.experimental import pallas as pl
from jax.experimental.pallas import tpu as pltpu


def _round_up(x, m):
    return ((x + m - 1) // m) * m


def _mlloss_kernel(emb_ref, ker_ref, kinv_ref, out_ref, *, s, eps):
    emb = emb_ref[...]                       # (TM, D), native dtype
    ker = ker_ref[...]                       # (D, TN), native dtype

    # Per-row inverse L2 norm of the embedding tile (f32 sum-of-squares + EUP rsqrt).
    emb_f32 = emb.astype(jnp.float32)
    row_inv = jax.lax.rsqrt(
        jnp.sum(emb_f32 * emb_f32, axis=1, keepdims=True) + eps)    # (TM, 1)

    # Raw matmul in the native input dtype, f32 accumulation on the MXU.
    raw = jnp.dot(emb, ker, preferred_element_type=jnp.float32)     # (TM, TN)

    # Post-scale to the true cosine, then clamp, then scale by s (order matters).
    cos = raw * row_inv * kinv_ref[...]                             # (TM, TN)
    out_ref[...] = (jnp.clip(cos, -1.0, 1.0) * s).astype(out_ref.dtype)


def mlloss_forward(embeddings, kernel, s=64.0, *, tm=256, tn=512, eps=1e-12):
    """Pallas implementation of MLLoss.forward.

    embeddings: (N, D) float array
    kernel:     (D, C) float array (the module's self.kernel parameter)
    returns:    (N, C) float32 scaled cosine logits
    """
    N, D = embeddings.shape
    D2, C = kernel.shape
    assert D == D2, "embedding dim mismatch"

    # Kernel column inverse norms: computed once here (tiny XLA reduce), streamed
    # to the kernel as a (1, TN) block so they are never recomputed per N-tile.
    ker_f32 = kernel.astype(jnp.float32)
    kinv = jax.lax.rsqrt(
        jnp.sum(ker_f32 * ker_f32, axis=0, keepdims=True) + eps)    # (1, C)

    # Lane/MXU-aligned tile sizes, clamped for tiny problems.
    tm = min(tm, _round_up(N, 8))
    tn = min(tn, _round_up(C, 128))

    n_pad = _round_up(N, tm)
    c_pad = _round_up(C, tn)

    emb_p = embeddings
    if n_pad != N:
        emb_p = jnp.pad(embeddings, ((0, n_pad - N), (0, 0)))
    ker_p, kinv_p = kernel, kinv
    if c_pad != C:
        ker_p = jnp.pad(kernel, ((0, 0), (0, c_pad - C)))
        kinv_p = jnp.pad(kinv, ((0, 0), (0, c_pad - C)))
    # (Padded rows/cols are zero -> raw dot is 0 -> 0 after scaling; sliced off below.)

    # Grid: C-tile index innermost so the embedding tile stays resident while the
    # kernel matrix (the larger array) streams through VMEM.
    grid = (n_pad // tm, c_pad // tn)

    out = pl.pallas_call(
        functools.partial(_mlloss_kernel, s=float(s), eps=float(eps)),
        out_shape=jax.ShapeDtypeStruct((n_pad, c_pad), jnp.float32),
        grid=grid,
        in_specs=[
            pl.BlockSpec((tm, D), lambda i, j: (i, 0)),   # emb tile, resident over j
            pl.BlockSpec((D, tn), lambda i, j: (0, j)),   # kernel column block
            pl.BlockSpec((1, tn), lambda i, j: (0, j)),   # precomputed 1/||col||
        ],
        out_specs=pl.BlockSpec((tm, tn), lambda i, j: (i, j)),
        compiler_params=pltpu.CompilerParams(
            dimension_semantics=("parallel", "parallel")),
    )(emb_p, ker_p, kinv_p)

    if n_pad != N or c_pad != C:
        out = out[:N, :C]
    return out


def _reference(embeddings, kernel, s=64.0):
    emb = embeddings.astype(jnp.float32)
    ker = kernel.astype(jnp.float32)
    emb_n = emb / jnp.linalg.norm(emb, ord=2, axis=1, keepdims=True)
    ker_n = ker / jnp.linalg.norm(ker, ord=2, axis=0, keepdims=True)
    cos = jnp.clip(emb_n @ ker_n, -1.0, 1.0)
    return cos * s


if __name__ == "__main__":
    key = jax.random.PRNGKey(0)

    # Case 1: small shapes matching the module (batch=8, emb dim=32, classes=128).
    N, D, C = 8, 32, 128
    k_emb, k_ker, k2_emb, k2_ker = jax.random.split(key, 4)
    embeddings = jax.random.normal(k_emb, (N, D), dtype=jnp.float32)
    kernel = jax.random.normal(k_ker, (D, C), dtype=jnp.float32)

    out = jax.block_until_ready(mlloss_forward(embeddings, kernel, s=64.0))
    ref = _reference(embeddings, kernel, s=64.0)
    assert out.shape == (N, C)
    assert jnp.allclose(out, ref, atol=1e-3, rtol=1e-3), "mismatch vs reference (case 1)"

    # Case 2: ragged shapes + small tiles to exercise the multi-tile grid,
    # padding, and embedding-tile residency across the C sweep.
    N2, D2, C2 = 40, 64, 300
    emb2 = jax.random.normal(k2_emb, (N2, D2), dtype=jnp.float32)
    ker2 = jax.random.normal(k2_ker, (D2, C2), dtype=jnp.float32)

    out2 = jax.block_until_ready(
        mlloss_forward(emb2, ker2, s=64.0, tm=16, tn=128))
    ref2 = _reference(emb2, ker2, s=64.0)
    assert out2.shape == (N2, C2)
    assert jnp.allclose(out2, ref2, atol=1e-3, rtol=1e-3), "mismatch vs reference (case 2)"

    print("KERNEL_OK")
</pallas_src>

<mosaic_0001>
module attributes {stable_mosaic.version = 11 : i64} {
  func.func @_mlloss_kernel(%arg0: i32, %arg1: i32, %arg2: memref<8x32xf32, #tpu.memory_space<vmem>>, %arg3: memref<32x128xf32, #tpu.memory_space<vmem>>, %arg4: memref<1x128xf32, #tpu.memory_space<vmem>>, %arg5: memref<8x128xf32, #tpu.memory_space<vmem>>) attributes {dimension_semantics = [#tpu.dimension_semantics<parallel>, #tpu.dimension_semantics<parallel>], iteration_bounds = array<i64: 1, 1>, scalar_prefetch = 0 : i64, scratch_operands = 0 : i64, tpu.core_type = #tpu.core_type<tc>, window_params = [{transform_indices = @transform_0, window_bounds = array<i64: 8, 32>}, {transform_indices = @transform_1, window_bounds = array<i64: 32, 128>}, {transform_indices = @transform_2, window_bounds = array<i64: 1, 128>}, {transform_indices = @transform_3, window_bounds = array<i64: 8, 128>}]} {
    %c0 = arith.constant 0 : index
    %c0_0 = arith.constant 0 : index
    %0 = vector.load %arg2[%c0, %c0_0] : memref<8x32xf32, #tpu.memory_space<vmem>>, vector<8x32xf32>
    %c0_1 = arith.constant 0 : index
    %c0_2 = arith.constant 0 : index
    %1 = vector.load %arg3[%c0_1, %c0_2] : memref<32x128xf32, #tpu.memory_space<vmem>>, vector<32x128xf32>
    %2 = arith.mulf %0, %0 : vector<8x32xf32>
    %cst = arith.constant dense<0.000000e+00> : vector<8xf32>
    %3 = vector.multi_reduction <add>, %2, %cst [1] : vector<8x32xf32> to vector<8xf32>
    %4 = vector.shape_cast %3 : vector<8xf32> to vector<8x1xf32>
    %cst_3 = arith.constant 9.99999996E-13 : f32
    %5 = vector.broadcast %cst_3 : f32 to vector<8x1xf32>
    %6 = arith.addf %4, %5 : vector<8x1xf32>
    %7 = math.rsqrt %6 : vector<8x1xf32>
    %cst_4 = arith.constant dense<0.000000e+00> : vector<8x128xf32>
    %8 = tpu.matmul %0, %1, %cst_4 {dimension_numbers = #tpu.dot_dimension_numbers<[1], [0], [0], [1], [0, 0, 1, 1], [], []>} : vector<8x32xf32>, vector<32x128xf32>, vector<8x128xf32> -> vector<8x128xf32>
    %9 = vector.broadcast %7 : vector<8x1xf32> to vector<8x128xf32>
    %10 = arith.mulf %8, %9 : vector<8x128xf32>
    %c0_5 = arith.constant 0 : index
    %c0_6 = arith.constant 0 : index
    %11 = vector.load %arg4[%c0_5, %c0_6] : memref<1x128xf32, #tpu.memory_space<vmem>>, vector<1x128xf32>
    %12 = vector.broadcast %11 : vector<1x128xf32> to vector<8x128xf32>
    %13 = arith.mulf %10, %12 : vector<8x128xf32>
    %cst_7 = arith.constant -1.000000e+00 : f32
    %cst_8 = arith.constant 1.000000e+00 : f32
    %14 = vector.broadcast %cst_7 : f32 to vector<8x128xf32>
    %15 = arith.maximumf %14, %13 : vector<8x128xf32>
    %16 = vector.broadcast %cst_8 : f32 to vector<8x128xf32>
    %17 = arith.minimumf %16, %15 : vector<8x128xf32>
    %cst_9 = arith.constant 6.400000e+01 : f32
    %18 = vector.broadcast %cst_9 : f32 to vector<8x128xf32>
    %19 = arith.mulf %17, %18 : vector<8x128xf32>
    %c0_10 = arith.constant 0 : index
    %c0_11 = arith.constant 0 : index
    %20 = vector.load %arg5[%c0_10, %c0_11] : memref<8x128xf32, #tpu.memory_space<vmem>>, vector<8x128xf32>
    tpu.vector_store %arg5[%c0_10, %c0_11], %19 {strides = array<i32>} : memref<8x128xf32, #tpu.memory_space<vmem>>, vector<8x128xf32>,
    return
  }
  func.func @transform_0(%arg0: i32, %arg1: i32) -> (i32, i32) {
    %c0_i32 = arith.constant 0 : i32
    %c0_i32_0 = arith.constant 0 : i32
    return %arg0, %c0_i32 : i32, i32
  }
  func.func @transform_1(%arg0: i32, %arg1: i32) -> (i32, i32) {
    %c0_i32 = arith.constant 0 : i32
    %c0_i32_0 = arith.constant 0 : i32
    return %c0_i32, %arg1 : i32, i32
  }
  func.func @transform_2(%arg0: i32, %arg1: i32) -> (i32, i32) {
    %c0_i32 = arith.constant 0 : i32
    %c0_i32_0 = arith.constant 0 : i32
    return %c0_i32, %arg1 : i32, i32
  }
  func.func @transform_3(%arg0: i32, %arg1: i32) -> (i32, i32) {
    %c0_i32 = arith.constant 0 : i32
    return %arg0, %arg1 : i32, i32
  }
}

</mosaic_0001>

<bundles_post_ra>
// kernel: tpu_custom_call.1
= control target key start
LH: loop header
LB: loop body
LE: loop exit
PB: predicated region body
PF: predicated region fallthrough
CT: control target
= control target key end

     0   :  { %8 = vsyncpa [#allocation3], 0  ;;  %s336_s0 = inlined_call_operand.hbm [shape: f32[8,32], index: 0, kind: input, shape index: {}]   ;;  %s337_s1 = inlined_call_operand.hbm [shape: f32[32,128], index: 1, kind: input, shape index: {}]   ;;  %s338_s2 = inlined_call_operand.vmem [shape: f32[1,128], index: 2, kind: input, shape index: {}]   ;;  %s339_s3 = inlined_call_operand.hbm [shape: f32[8,128], index: 3, kind: output, shape index: {}]  }
   0x1   :  { %9 = vsyncpa [#allocation6], 0 }
   0x2   :  { %10 = vsyncpa [#allocation4], 0  ;;  %s262_s12 = smov [#allocation2]   ;;  %s263_s14 = smov [#allocation5]  }
   0x3   :  { %s17_s13 = sshll.u32 %s262_s12, 4  ;;  %s26_s15 = sshll.u32 %s263_s14, 4  ;;  %s18_s13 = int_to_ptr.vmem [resolvable:$true] %s17_s13  ;;  %s290_s15 = int_to_ptr.vmem [resolvable:$true] %s26_s15 }
   0x4   :  { %s190_s18 = scalar_lea.hbm %s336_s0, 128 }
   0x5   :  { %p191_p0 = scmp.ne.s32.totalorder %s336_s0, %s190_s18  ;;  %p194_p1 = scmp.lt.u32.totalorder %s190_s18, %s336_s0 }
   0x7   :  { %p196_p2 = pnand %p194_p1, %p191_p0 }
   0x9   :  { %199 = shalt.err (!%p196_p2)
}
   0xa   :  { %s200_s23 = scalar_lea.vmem %s18_s13, 128  ;;  %p205_p4 = scmp.lt.s32.totalorder %s18_s13, %s18_s13 }
   0xb   :  { %p201_p3 = scmp.ne.s32.totalorder %s18_s13, %s200_s23  ;;  %p206_p5 = scmp.lt.s32.totalorder %s200_s23, %s200_s23 }
   0xd   :  { %p207_p6 = por %p206_p5, %p205_p4 }
   0xf   :  { %p208_p7 = pnand %p207_p6, %p201_p3 }
  0x11   :  { %211 = shalt.err (!%p208_p7)
}
  0x12   :  { %20 = dma.hbm_to_vmem [thread:$0]  %s336_s0, 128, %s18_s13, [#allocation3]  }
  0x13   :  { %s212_s28 = scalar_lea.hbm %s337_s1, 512 }
  0x14   :  { %p213_p8 = scmp.ne.s32.totalorder %s337_s1, %s212_s28  ;;  %p216_p9 = scmp.lt.u32.totalorder %s212_s28, %s337_s1 }
  0x16   :  { %p218_p10 = pnand %p216_p9, %p213_p8 }
  0x18   :  { %221 = shalt.err (!%p218_p10)
}
  0x19   :  { %s222_s6 = scalar_lea.vmem %s290_s15, 512  ;;  %p227_p12 = scmp.lt.s32.totalorder %s290_s15, %s290_s15 }
  0x1a   :  { %p223_p11 = scmp.ne.s32.totalorder %s290_s15, %s222_s6  ;;  %p228_p13 = scmp.lt.s32.totalorder %s222_s6, %s222_s6 }
  0x1c   :  { %p229_p0 = por %p228_p13, %p227_p12 }
  0x1e   :  { %p230_p1 = pnand %p229_p0, %p223_p11 }
  0x20   :  { %233 = shalt.err (!%p230_p1)
}
  0x21   :  { %s264_s0 = smov 128   ;;  %s265_s7 = smov 8  }
  0x22   :  { %32 = dma.hbm_to_vmem [thread:$0]  %s337_s1, 512, %s290_s15, [#allocation6], %s264_s0, %s264_s0, %s265_s7  }
  0x23   :  { %256 = dma.done.wait [#allocation3], 128  }
  0x24   :  { %257 = vsyncadd [#allocation3], 4294967168 }
  0x25   :  { %258 = dma.done.wait [#allocation6], 512  }
  0x26   :  { %259 = vsyncadd [#allocation6], 4294966784  ;;  %v266_v0 = vmov 0.0|0.0   ;;  %vm267_vm0 = vmmov 0   ;;  %v268_v1 = vmov 0.0   ;;  %v42_v2 = vld [vmem:[#allocation5] sm:$0xff] }
  0x27   :  { %174 = vmatprep.subr.bf16.mxu0 %v266_v0  ;;  %171 = vmatprep.mubr.msk.f32.mxu0 %vm267_vm0, %v268_v1  ;;  %v43_v3 = vld [vmem:[#allocation5 + $0x8] sm:$0xff]  ;;  %v44_v4 = vld [vmem:[#allocation5 + $0x10] sm:$0xff]  ;;  %v45_v6 = vld [vmem:[#allocation5 + $0x18] sm:$0xff]  ;;  %vm47_vm1 = vcmask 261120   ;;  %s269_s11 = smov [#allocation7]  }
  0x28   :  { %v175_v5 = vpack.c.bf16 %v43_v3, %v42_v2  ;;  %v41_v7 = vld [vmem:[#allocation2] sm:$0xff]  ;;  %v178_v9 = vpack.c.bf16 %v45_v6, %v44_v4  ;;  %s145_s12 = sshll.u32 %s269_s11, 4  ;;  %s146_s12 = int_to_ptr.vmem [resolvable:$true] %s145_s12 }
  0x29   :  { %v46_v8 = vmul.f32 %v41_v7, %v41_v7  ;;  %v156_v15 = vld [vmem:[%s338_s2] ss:$0 sm:$0xff]  ;;  %s234_s13 = scalar_lea.vmem %s146_s12, 128  ;;  %p239_p3 = scmp.lt.s32.totalorder %s146_s12, %s146_s12 }
  0x2a   :  { %176 = vmatpush3.bf16.msra.mxu0 %v175_v5  ;;  %p235_p2 = scmp.ne.s32.totalorder %s146_s12, %s234_s13  ;;  %p240_p4 = scmp.lt.s32.totalorder %s234_s13, %s234_s13 }
  0x2b   :  { %177 = vmatprep.subr.bf16.mxu0 %v266_v0  ;;  %v48_v10 = vsel %vm47_vm1, %v46_v8, 0.0 }
  0x2c   :  { %49 = vadd.xlane.f32.xlu0 %v48_v10  ;;  %p241_p5 = por %p240_p4, %p239_p3 }
  0x2e   :  { %179 = vmatpush3.bf16.msra.mxu0 %v178_v9  ;;  %p242_p6 = pnand %p241_p5, %p235_p2 }
  0x31   :  { %172 = vmatmul.mubr.msk.f32.vlgmr.msra.gmra.mrb[0].mxu0 %vm47_vm1, %v41_v7 }
  0xb9   :  { %v50_v11 = vpop.xlane.xlu0 %49 }
  0xba   :  { %v51_v12 = vadd.f32 1e-12, %v50_v11 }
  0xbc   :  { %188 = vrsqrt.f32 %v51_v12 }
  0xc6   :  { %v189_v13 = vpop.eup %188 }
 0x104   :  { %v122_v14 = vpop.f32.mrb[0].mxu0 }
 0x105   :  { %v126_v16 = vmul.f32 %v189_v13, %v122_v14  ;;  %v173_v17 = vpop.f32.mrb[1].mxu0 }
 0x107   :  { %v134_v18 = vmul.f32 %v156_v15, %v126_v16 }
 0x109   :  { %v157_v19 = vclamps-f32 %v134_v18, 1.0 }
 0x10b   :  { %v137_v20 = vmul.f32 64.0, %v157_v19 }
 0x10d   :  { %138 = vst [vmem:[#allocation7] sm:$0xff] %v137_v20 }
 0x10e   :  { %245 = shalt.err (!%p242_p6)
}
 0x10f   :  { %s246_s2 = scalar_lea.hbm %s339_s3, 128 }
 0x110   :  { %p247_p7 = scmp.ne.s32.totalorder %s339_s3, %s246_s2  ;;  %p250_p8 = scmp.lt.u32.totalorder %s246_s2, %s339_s3 }
 0x112   :  { %p252_p9 = pnand %p250_p8, %p247_p7 }
 0x114   :  { %255 = shalt.err (!%p252_p9)
}
 0x115   :  { %148 = dma.vmem_to_hbm [thread:$0]  %s146_s12, 128, %s339_s3, [#allocation4]  }
 0x116   :  { %260 = dma.done.wait [#allocation4], 128  }
 0x117   :  { %261 = vsyncadd [#allocation4], 4294967168 }
 0x118   :  { %152 = vsyncpa [#allocation3], 1 }
 0x119   :  { %153 = vsyncpa [#allocation6], 1 }
 0x11a   :  { %154 = vsyncpa [#allocation4], 1 }

</bundles_post_ra>
